<compile_context>
chip_gen: v7x
topology: tpu7x:2x2x1
jax: 0.10.0
libtpu: 0.0.40
codegen_flags: <defaults>
</compile_context>

<pallas_src>
import functools

import jax
import jax.numpy as jnp
from jax.experimental import pallas as pl
from jax.experimental.pallas import tpu as pltpu

EPS = 1e-16  # matches LayerNormalization(epsilon=1e-16); representable in f32.


# ---------------------------------------------------------------------------
# Kernel
# ---------------------------------------------------------------------------
def _block_wrapper_kernel(x_ref, gamma_ref, beta_ref, w_ref, b_ref, o_ref, norm_ref):
    # x_ref:     (TM, D)   row tile (block index constant across j -> no re-DMA)
    # gamma_ref: (1, D)    layernorm scale (f32)
    # beta_ref:  (1, D)    layernorm shift (f32)
    # w_ref:     (D, TN)   linear weight column block, (in, out) layout, bf16
    # b_ref:     (1, TN)   linear bias columns (f32)
    # o_ref:     (TM, TN)  output tile
    # norm_ref:  (TM, D)   bf16 scratch caching LayerNorm(x) for the column sweep
    j = pl.program_id(1)
    d = x_ref.shape[-1]
    tn = o_ref.shape[-1]

    # LayerNorm over the last dim (biased variance), computed once per row tile.
    # All elementwise math in f32 on the VPU/EUP (v5e has no bf16 VPU/EUP path).
    @pl.when(j == 0)
    def _():
        x = x_ref[...].astype(jnp.float32)
        mean = jnp.mean(x, axis=-1, keepdims=True)
        xc = x - mean
        var = jnp.mean(xc * xc, axis=-1, keepdims=True)
        inv_std = jax.lax.rsqrt(var + EPS)
        norm = xc * inv_std * gamma_ref[...] + beta_ref[...]
        norm_ref[...] = norm.astype(jnp.bfloat16)

    # Wrapped layer: Linear(D -> D) column block on the MXU, f32 accumulation.
    y = jnp.dot(norm_ref[...], w_ref[...],
                preferred_element_type=jnp.float32) + b_ref[...]

    # Residual add: matching columns of the resident x row tile.
    if tn == d:
        x_cols = x_ref[...].astype(jnp.float32)
    else:
        col = pl.multiple_of(j * tn, 128)  # tn is a multiple of 128 on this path
        x_cols = x_ref[:, pl.ds(col, tn)].astype(jnp.float32)
    o_ref[...] = (x_cols + y).astype(o_ref.dtype)


# ---------------------------------------------------------------------------
# Tiling heuristics
# ---------------------------------------------------------------------------
def _round_up(x, m):
    return ((x + m - 1) // m) * m


@functools.lru_cache(maxsize=1)
def _vmem_capacity_bytes():
    """Per-core VMEM capacity; conservative 64 MiB (v7x) fallback."""
    try:
        info = pltpu.get_tpu_info()
        for name in ("vmem_capacity_bytes", "vmem_size_bytes", "vmem_bytes"):
            cap = getattr(info, name, None)
            if cap:
                return min(int(cap), 128 * 1024 * 1024)
    except Exception:
        pass
    return 64 * 1024 * 1024


def _choose_tile_n(d, budget):
    """Weight-column tile: full D (resident weight) if it fits comfortably,
    otherwise lane-dense (multiple-of-128) column blocks that divide D."""
    if d % 128 != 0:
        # Full-dim exemption path (e.g. the D=32 demo).  See TODO in the wrapper.
        return d
    if d * d * 2 <= budget // 2:       # resident bf16 weight leaves room for row tiles
        return d
    for tn in (1024, 512, 256, 128):
        if tn <= d and d % tn == 0 and 2 * d * tn * 2 <= budget // 2:
            return tn
    return 128


def _choose_tile_m(m_rows, d, tn, x_bytes, budget, *, resident_w, num_cores=2):
    """Largest MXU-friendly row tile that fits the VMEM budget (incl. temporaries)."""

    def vmem_bytes(t):
        io = 2 * t * d * x_bytes + 2 * t * tn * x_bytes   # double-buffered x-in / out
        w = (1 if resident_w else 2) * d * tn * 2         # bf16 weight block(s)
        scratch = t * d * 2                               # bf16 LayerNorm cache
        temps = 3 * t * d * 4 + 2 * t * tn * 4            # in-kernel f32 temporaries
        params = 4 * 2 * d * 4                            # gamma / beta / bias (+ slack)
        return io + w + scratch + temps + params

    # Keep >= num_cores row tiles when there are enough rows so megacore
    # ("parallel" on the row axis) can shard them across TensorCores (v7x).
    max_tm = _round_up(m_rows, 8)
    if m_rows > 8 * num_cores:
        max_tm = min(max_tm, _round_up(pl.cdiv(m_rows, num_cores), 8))

    tm = min(1024, max_tm)
    while tm > 128 and vmem_bytes(tm) > budget:   # MXU-friendly steps: 1024/512/256/128
        tm = max(128, tm // 2)
    while tm > 8 and vmem_bytes(tm) > budget:     # last resort for huge D
        tm = max(8, _round_up(tm // 2, 8))
    return tm


# ---------------------------------------------------------------------------
# Wrapper
# ---------------------------------------------------------------------------
@jax.jit
def block_wrapper(x, gamma, beta, w, b):
    """x: (B, S, D).  Returns x + Linear(LayerNorm(x)).

    `w` is the Linear weight in (in, out) layout (= W_torch.T).  It is consumed
    in bf16 (store it bf16 upstream: the astype below is then a no-op and the
    weight HBM read is halved).  x / output keep the caller's dtype — pass bf16
    activations to halve the dominant HBM traffic of this bandwidth-bound op.
    """
    B, S, D = x.shape
    M = B * S
    xf = x.reshape(M, D)                      # contiguous reshape: no HBM copy

    gamma2 = gamma.reshape(1, D).astype(jnp.float32)
    beta2 = beta.reshape(1, D).astype(jnp.float32)
    b2 = b.reshape(1, D).astype(jnp.float32)
    w_bf16 = w.astype(jnp.bfloat16)           # no-op if already stored bf16

    cap = _vmem_capacity_bytes()
    budget = int(cap * 0.70)                  # tile-chooser budget (compiler headroom)
    vmem_limit = int(cap * 0.85)

    tn = _choose_tile_n(D, budget)
    n_col = pl.cdiv(D, tn)
    resident_w = n_col == 1
    tm = _choose_tile_m(M, D, tn, x.dtype.itemsize, budget, resident_w=resident_w)
    n_row = pl.cdiv(M, tm)                    # ragged last row tile: masked stores

    # TODO(synk): for hidden sizes that are not a multiple of 128 (like this D=32
    # demo) the kernel relies on the full-dim exemption and lane occupancy is low;
    # production callers should store params/activations with D padded to 128.

    if resident_w:
        # Constant block index -> keep one resident copy instead of double-buffering.
        w_spec = pl.BlockSpec((D, tn), lambda i, j: (0, j),
                              pipeline_mode=pl.Buffered(buffer_count=1))
    else:
        w_spec = pl.BlockSpec((D, tn), lambda i, j: (0, j))   # streamed, double-buffered

    out = pl.pallas_call(
        _block_wrapper_kernel,
        out_shape=jax.ShapeDtypeStruct((M, D), x.dtype),
        grid_spec=pltpu.PrefetchScalarGridSpec(
            num_scalar_prefetch=0,
            grid=(n_row, n_col),
            in_specs=[
                pl.BlockSpec((tm, D), lambda i, j: (i, 0)),   # x rows (reused across j)
                pl.BlockSpec((1, D), lambda i, j: (0, 0)),    # gamma
                pl.BlockSpec((1, D), lambda i, j: (0, 0)),    # beta
                w_spec,                                       # W column block
                pl.BlockSpec((1, tn), lambda i, j: (0, j)),   # bias columns
            ],
            out_specs=pl.BlockSpec((tm, tn), lambda i, j: (i, j)),
            scratch_shapes=[pltpu.VMEM((tm, D), jnp.bfloat16)],  # LayerNorm(x) cache
        ),
        compiler_params=pltpu.CompilerParams(
            dimension_semantics=("parallel", "arbitrary"),  # rows shard across cores;
            vmem_limit_bytes=vmem_limit,                    # j carries the norm scratch
        ),
    )(xf, gamma2, beta2, w_bf16, b2)

    return out.reshape(B, S, D)


# ---------------------------------------------------------------------------
# References
# ---------------------------------------------------------------------------
def reference_f32(x, gamma, beta, w, b):
    xf = x.astype(jnp.float32)
    mean = jnp.mean(xf, axis=-1, keepdims=True)
    xc = xf - mean
    var = jnp.mean(xc * xc, axis=-1, keepdims=True)
    norm = xc * jax.lax.rsqrt(var + EPS) * gamma + beta
    y = norm @ w + b
    return (xf + y).astype(x.dtype)


def reference_bf16_matmul(x, gamma, beta, w, b):
    # Precision-matched to the kernel: f32 LayerNorm, bf16 MXU operands, f32 accumulate.
    xf = x.astype(jnp.float32)
    mean = jnp.mean(xf, axis=-1, keepdims=True)
    xc = xf - mean
    var = jnp.mean(xc * xc, axis=-1, keepdims=True)
    norm = xc * jax.lax.rsqrt(var + EPS) * gamma + beta
    y = jnp.dot(norm.astype(jnp.bfloat16), w.astype(jnp.bfloat16),
                preferred_element_type=jnp.float32) + b
    return (xf + y).astype(x.dtype)


if __name__ == "__main__":
    B, S, D = 2, 8, 32  # batch=2, seq=8, hidden=32 (in_features = 32)

    key = jax.random.PRNGKey(0)
    kx, kw, kb = jax.random.split(key, 3)

    x = jax.random.normal(kx, (B, S, D), dtype=jnp.float32)

    # Deterministic parameter init (synthetic, not a checkpoint).
    gamma = jnp.ones((D,), dtype=jnp.float32)          # LayerNormalization gamma
    beta = jnp.zeros((D,), dtype=jnp.float32)          # LayerNormalization beta
    bound = 1.0 / (D ** 0.5)
    w = jax.random.uniform(kw, (D, D), jnp.float32, -bound, bound)  # Linear weight (in, out)
    b = jax.random.uniform(kb, (D,), jnp.float32, -bound, bound)    # Linear bias

    # Store the weight in bf16 upstream (MXU operand dtype): skips a per-call
    # f32->bf16 convert and halves the weight HBM read.
    w_bf16 = w.astype(jnp.bfloat16)

    out = jax.block_until_ready(block_wrapper(x, gamma, beta, w_bf16, b))

    assert out.shape == (B, S, D)
    assert bool(jnp.all(jnp.isfinite(out)))

    # Precision-matched reference (bf16 MXU operands, f32 accumulation): tight.
    ref_matched = reference_bf16_matmul(x, gamma, beta, w, b)
    assert jnp.allclose(out, ref_matched, atol=2e-3, rtol=2e-3), "mismatch vs bf16-matmul reference"

    # Full-f32 reference: looser tolerance covers only the bf16 matmul operands.
    ref_f32 = reference_f32(x, gamma, beta, w, b)
    assert jnp.allclose(out, ref_f32, atol=3e-2, rtol=3e-2), "mismatch vs f32 reference"

    print("KERNEL_OK")
</pallas_src>

<mosaic_0001>
module attributes {stable_mosaic.version = 11 : i64} {
  func.func @_block_wrapper_kernel(%arg0: i32, %arg1: i32, %arg2: memref<16x32xf32, #tpu.memory_space<vmem>>, %arg3: memref<1x32xf32, #tpu.memory_space<vmem>>, %arg4: memref<1x32xf32, #tpu.memory_space<vmem>>, %arg5: memref<32x32xbf16, #tpu.memory_space<vmem>>, %arg6: memref<1x32xf32, #tpu.memory_space<vmem>>, %arg7: memref<16x32xf32, #tpu.memory_space<vmem>>, %arg8: memref<16x32xbf16, #tpu.memory_space<vmem>>) attributes {dimension_semantics = [#tpu.dimension_semantics<parallel>, #tpu.dimension_semantics<arbitrary>], iteration_bounds = array<i64: 1, 1>, scalar_prefetch = 0 : i64, scratch_operands = 1 : i64, tpu.core_type = #tpu.core_type<tc>, window_params = [{transform_indices = @transform_0, window_bounds = array<i64: 16, 32>}, {pipeline_mode = #tpu.pipeline_mode<synchronous>, transform_indices = @transform_1, window_bounds = array<i64: 1, 32>}, {pipeline_mode = #tpu.pipeline_mode<synchronous>, transform_indices = @transform_2, window_bounds = array<i64: 1, 32>}, {pipeline_mode = #tpu.pipeline_mode<synchronous>, transform_indices = @transform_3, window_bounds = array<i64: 32, 32>}, {transform_indices = @transform_4, window_bounds = array<i64: 1, 32>}, {transform_indices = @transform_5, window_bounds = array<i64: 16, 32>}]} {
    %c0_i32 = arith.constant 0 : i32
    %0 = arith.cmpi eq, %arg1, %c0_i32 : i32
    %1 = arith.extui %0 : i1 to i32
    %c0_i32_0 = arith.constant 0 : i32
    %2 = arith.cmpi ne, %1, %c0_i32_0 : i32
    scf.if %2 {
      %c0_10 = arith.constant 0 : index
      %c0_11 = arith.constant 0 : index
      %12 = vector.load %arg2[%c0_10, %c0_11] : memref<16x32xf32, #tpu.memory_space<vmem>>, vector<16x32xf32>
      %cst_12 = arith.constant dense<0.000000e+00> : vector<16xf32>
      %13 = vector.multi_reduction <add>, %12, %cst_12 [1] : vector<16x32xf32> to vector<16xf32>
      %14 = vector.shape_cast %13 : vector<16xf32> to vector<16x1xf32>
      %cst_13 = arith.constant 3.200000e+01 : f32
      %15 = vector.broadcast %cst_13 : f32 to vector<16x1xf32>
      %16 = arith.divf %14, %15 : vector<16x1xf32>
      %17 = vector.broadcast %16 : vector<16x1xf32> to vector<16x32xf32>
      %18 = arith.subf %12, %17 : vector<16x32xf32>
      %19 = arith.mulf %18, %18 : vector<16x32xf32>
      %cst_14 = arith.constant dense<0.000000e+00> : vector<16xf32>
      %20 = vector.multi_reduction <add>, %19, %cst_14 [1] : vector<16x32xf32> to vector<16xf32>
      %21 = vector.shape_cast %20 : vector<16xf32> to vector<16x1xf32>
      %cst_15 = arith.constant 3.200000e+01 : f32
      %22 = vector.broadcast %cst_15 : f32 to vector<16x1xf32>
      %23 = arith.divf %21, %22 : vector<16x1xf32>
      %cst_16 = arith.constant 1.000000e-16 : f32
      %24 = vector.broadcast %cst_16 : f32 to vector<16x1xf32>
      %25 = arith.addf %23, %24 : vector<16x1xf32>
      %26 = math.rsqrt %25 : vector<16x1xf32>
      %27 = vector.broadcast %26 : vector<16x1xf32> to vector<16x32xf32>
      %28 = arith.mulf %18, %27 : vector<16x32xf32>
      %c0_17 = arith.constant 0 : index
      %c0_18 = arith.constant 0 : index
      %29 = vector.load %arg3[%c0_17, %c0_18] : memref<1x32xf32, #tpu.memory_space<vmem>>, vector<1x32xf32>
      %30 = vector.broadcast %29 : vector<1x32xf32> to vector<16x32xf32>
      %31 = arith.mulf %28, %30 : vector<16x32xf32>
      %c0_19 = arith.constant 0 : index
      %c0_20 = arith.constant 0 : index
      %32 = vector.load %arg4[%c0_19, %c0_20] : memref<1x32xf32, #tpu.memory_space<vmem>>, vector<1x32xf32>
      %33 = vector.broadcast %32 : vector<1x32xf32> to vector<16x32xf32>
      %34 = arith.addf %31, %33 : vector<16x32xf32>
      %35 = arith.truncf %34 : vector<16x32xf32> to vector<16x32xbf16>
      %c0_21 = arith.constant 0 : index
      %c0_22 = arith.constant 0 : index
      %36 = vector.load %arg8[%c0_21, %c0_22] : memref<16x32xbf16, #tpu.memory_space<vmem>>, vector<16x32xbf16>
      tpu.vector_store %arg8[%c0_21, %c0_22], %35 {strides = array<i32>} : memref<16x32xbf16, #tpu.memory_space<vmem>>, vector<16x32xbf16>,
    } else {
    }
    %c0 = arith.constant 0 : index
    %c0_1 = arith.constant 0 : index
    %3 = vector.load %arg8[%c0, %c0_1] : memref<16x32xbf16, #tpu.memory_space<vmem>>, vector<16x32xbf16>
    %c0_2 = arith.constant 0 : index
    %c0_3 = arith.constant 0 : index
    %4 = vector.load %arg5[%c0_2, %c0_3] : memref<32x32xbf16, #tpu.memory_space<vmem>>, vector<32x32xbf16>
    %cst = arith.constant dense<0.000000e+00> : vector<16x32xf32>
    %5 = tpu.matmul %3, %4, %cst {dimension_numbers = #tpu.dot_dimension_numbers<[1], [0], [0], [1], [0, 0, 1, 1], [], []>} : vector<16x32xbf16>, vector<32x32xbf16>, vector<16x32xf32> -> vector<16x32xf32>
    %c0_4 = arith.constant 0 : index
    %c0_5 = arith.constant 0 : index
    %6 = vector.load %arg6[%c0_4, %c0_5] : memref<1x32xf32, #tpu.memory_space<vmem>>, vector<1x32xf32>
    %7 = vector.broadcast %6 : vector<1x32xf32> to vector<16x32xf32>
    %8 = arith.addf %5, %7 : vector<16x32xf32>
    %c0_6 = arith.constant 0 : index
    %c0_7 = arith.constant 0 : index
    %9 = vector.load %arg2[%c0_6, %c0_7] : memref<16x32xf32, #tpu.memory_space<vmem>>, vector<16x32xf32>
    %10 = arith.addf %9, %8 : vector<16x32xf32>
    %c0_8 = arith.constant 0 : index
    %c0_9 = arith.constant 0 : index
    %11 = vector.load %arg7[%c0_8, %c0_9] : memref<16x32xf32, #tpu.memory_space<vmem>>, vector<16x32xf32>
    tpu.vector_store %arg7[%c0_8, %c0_9], %10 {strides = array<i32>} : memref<16x32xf32, #tpu.memory_space<vmem>>, vector<16x32xf32>,
    return
  }
  func.func @transform_0(%arg0: i32, %arg1: i32) -> (i32, i32) {
    %c0_i32 = arith.constant 0 : i32
    %c0_i32_0 = arith.constant 0 : i32
    return %arg0, %c0_i32 : i32, i32
  }
  func.func @transform_1(%arg0: i32, %arg1: i32) -> (i32, i32) {
    %c0_i32 = arith.constant 0 : i32
    %c0_i32_0 = arith.constant 0 : i32
    %c0_i32_1 = arith.constant 0 : i32
    return %c0_i32, %c0_i32_0 : i32, i32
  }
  func.func @transform_2(%arg0: i32, %arg1: i32) -> (i32, i32) {
    %c0_i32 = arith.constant 0 : i32
    %c0_i32_0 = arith.constant 0 : i32
    %c0_i32_1 = arith.constant 0 : i32
    return %c0_i32, %c0_i32_0 : i32, i32
  }
  func.func @transform_3(%arg0: i32, %arg1: i32) -> (i32, i32) {
    %c0_i32 = arith.constant 0 : i32
    %c0_i32_0 = arith.constant 0 : i32
    return %c0_i32, %arg1 : i32, i32
  }
  func.func @transform_4(%arg0: i32, %arg1: i32) -> (i32, i32) {
    %c0_i32 = arith.constant 0 : i32
    %c0_i32_0 = arith.constant 0 : i32
    return %c0_i32, %arg1 : i32, i32
  }
  func.func @transform_5(%arg0: i32, %arg1: i32) -> (i32, i32) {
    %c0_i32 = arith.constant 0 : i32
    return %arg0, %arg1 : i32, i32
  }
}

</mosaic_0001>

<bundles_post_ra>
// kernel: block_wrapper.1
= control target key start
LH: loop header
LB: loop body
LE: loop exit
PB: predicated region body
PF: predicated region fallthrough
CT: control target
= control target key end

     0   :  { %10 = vsyncpa [#allocation4], 0  ;;  %s348_s0 = inlined_call_operand.hbm [shape: f32[16,32], index: 0, kind: input, shape index: {}]   ;;  %s349_s1 = inlined_call_operand.vmem [shape: f32[1,32], index: 1, kind: input, shape index: {}]   ;;  %s350_s2 = inlined_call_operand.vmem [shape: f32[1,32], index: 2, kind: input, shape index: {}]   ;;  %s351_s3 = inlined_call_operand.vmem [shape: bf16[32,32], index: 3, kind: input, shape index: {}]   ;;  %s352_s4 = inlined_call_operand.vmem [shape: f32[1,32], index: 4, kind: input, shape index: {}]   ;;  %s353_s5 = inlined_call_operand.hbm [shape: f32[16,32], index: 5, kind: output, shape index: {}]  }
   0x1   :  { %11 = vsyncpa [#allocation5], 0  ;;  %s259_s18 = smov [#allocation3]   ;;  %s211_s22 = scalar_lea.hbm %s348_s0, 256 }
   0x2   :  { %s17_s19 = sshll.u32 %s259_s18, 4  ;;  %p212_p0 = scmp.ne.s32.totalorder %s348_s0, %s211_s22  ;;  %s18_s19 = int_to_ptr.vmem [resolvable:$true] %s17_s19 }
   0x3   :  { %p215_p1 = scmp.lt.u32.totalorder %s211_s22, %s348_s0 }
   0x5   :  { %p217_p2 = pnand %p215_p1, %p212_p0 }
   0x7   :  { %220 = shalt.err (!%p217_p2)
}
   0x8   :  { %s221_s27 = scalar_lea.vmem %s18_s19, 256  ;;  %p226_p4 = scmp.lt.s32.totalorder %s18_s19, %s18_s19 }
   0x9   :  { %p222_p3 = scmp.ne.s32.totalorder %s18_s19, %s221_s27  ;;  %p227_p5 = scmp.lt.s32.totalorder %s221_s27, %s221_s27 }
   0xb   :  { %p228_p6 = por %p227_p5, %p226_p4 }
   0xd   :  { %p229_p7 = pnand %p228_p6, %p222_p3 }
   0xf   :  { %232 = shalt.err (!%p229_p7)
}
  0x10   :  { %s260_s28 = smov 128   ;;  %s261_s29 = smov 8  }
  0x11   :  { %23 = dma.hbm_to_vmem [thread:$0]  %s348_s0, 256, %s18_s19, [#allocation4], %s260_s28, %s260_s28, %s261_s29  }
  0x12   :  { %255 = dma.done.wait [#allocation4], 256  }
  0x13   :  { %256 = vsyncadd [#allocation4], 4294967040  ;;  %vm42_vm0 = vcmask 261120   ;;  %v40_v0 = vld [vmem:[#allocation3] sm:$0xff]  ;;  %v41_v1 = vld [vmem:[#allocation3 + $0x8] sm:$0xff]  ;;  %v262_v15 = vmov 0.0  }
  0x14   :  { %v43_v2 = vsel %vm42_vm0, %v40_v0, 0.0  ;;  %v46_v3 = vsel %vm42_vm0, %v41_v1, 0.0  ;;  %v205_v14 = vld [vmem:[%s351_s3] sm:$0xff]   ;;  %191 = vmatprep.subr.bf16.mxu0 %v262_v15  ;;  %v206_v16 = vld [vmem:[%s351_s3 + $0x8] sm:$0xff]   ;;  %vm263_vm1 = vmmov 0  }
  0x15   :  { %44 = vadd.xlane.f32.xlu0 %v43_v2  ;;  %192 = vmatpush3.bf16.msra.mxu0 %v205_v14  ;;  %v182_v25 = vld [vmem:[%s349_s1] ss:$0 sm:$0xff]  ;;  %s264_s1 = smov [#allocation6]  }
  0x16   :  { %195 = vmatprep.mubr.msk.bf16.mxu0 %vm263_vm1, %v262_v15  ;;  %193 = vmatprep.subr.bf16.mxu0 %v262_v15  ;;  %v183_v29 = vld [vmem:[%s350_s2] ss:$0 sm:$0xff]  ;;  %s170_s15 = sshll.u32 %s264_s1, 4  ;;  %s171_s15 = int_to_ptr.vmem [resolvable:$true] %s170_s15 }
  0x17   :  { %v184_v35 = vld [vmem:[%s352_s4] ss:$0 sm:$0xff]  ;;  %s233_s2 = scalar_lea.vmem %s171_s15, 256  ;;  %p238_p9 = scmp.lt.s32.totalorder %s171_s15, %s171_s15 }
  0x18   :  { %p234_p8 = scmp.ne.s32.totalorder %s171_s15, %s233_s2  ;;  %p239_p10 = scmp.lt.s32.totalorder %s233_s2, %s233_s2 }
  0x19   :  { %47 = vadd.xlane.f32.xlu0 %v46_v3  ;;  %194 = vmatpush3.bf16.msra.mxu0 %v206_v16 }
  0x1a   :  { %p240_p11 = por %p239_p10, %p238_p9 }
  0x1c   :  { %p241_p12 = pnand %p240_p11, %p234_p8 }
  0xa2   :  { %v45_v4 = vpop.xlane.xlu0 %44 }
  0xa3   :  { %v50_v5 = vmul.f32 0.03125, %v45_v4 }
  0xa5   :  { %v52_v6 = vsub.f32 %v40_v0, %v50_v5 }
  0xa6   :  { %v48_v7 = vpop.xlane.xlu0 %47 }
  0xa7   :  { %v51_v8 = vmul.f32 0.03125, %v48_v7  ;;  %v54_v9 = vmul.f32 %v52_v6, %v52_v6 }
  0xa9   :  { %v53_v10 = vsub.f32 %v41_v1, %v51_v8  ;;  %v56_v11 = vsel %vm42_vm0, %v54_v9, 0.0 }
  0xaa   :  { %57 = vadd.xlane.f32.xlu1 %v56_v11 }
  0xab   :  { %v55_v12 = vmul.f32 %v53_v10, %v53_v10 }
  0xad   :  { %v59_v13 = vsel %vm42_vm0, %v55_v12, 0.0 }
  0xae   :  { %60 = vadd.xlane.f32.xlu1 %v59_v13 }
 0x137   :  { %v58_v17 = vpop.xlane.xlu1 %57 }
 0x138   :  { %v62_v18 = vmul.f32 0.03125, %v58_v17 }
 0x13a   :  { %v64_v19 = vadd.f32 1e-16, %v62_v18 }
 0x13b   :  { %v61_v20 = vpop.xlane.xlu1 %60 }
 0x13c   :  { %207 = vrsqrt.f32 %v64_v19  ;;  %v63_v21 = vmul.f32 0.03125, %v61_v20 }
 0x13e   :  { %v65_v22 = vadd.f32 1e-16, %v63_v21 }
 0x140   :  { %209 = vrsqrt.f32 %v65_v22 }
 0x146   :  { %v208_v23 = vpop.eup %207 }
 0x147   :  { %v68_v24 = vmul.f32 %v208_v23, %v52_v6 }
 0x149   :  { %v77_v27 = vmul.f32 %v182_v25, %v68_v24 }
 0x14a   :  { %v210_v26 = vpop.eup %209 }
 0x14b   :  { %v69_v28 = vmul.f32 %v210_v26, %v53_v10  ;;  %v86_v31 = vadd.f32 %v183_v29, %v77_v27 }
 0x14d   :  { %v78_v30 = vmul.f32 %v182_v25, %v69_v28 }
 0x14f   :  { %v87_v32 = vadd.f32 %v183_v29, %v78_v30 }
 0x151   :  { %v88_v33 = vpack.c.bf16 %v87_v32, %v86_v31 }
 0x153   :  { %89 = vst.msk [vmem:[#allocation2] sm:$0xff] %vm42_vm0, %v88_v33 }
 0x15a   :  { %v90_v34 = vld [vmem:[#allocation2] sm:$0xff] }
 0x15b   :  { %196 = vmatmul.mubr.msk.bf16.vlgmr.msra.gmra.mrb[0].mxu0 %vm42_vm0, %v90_v34 }
 0x22e   :  { %v152_v36 = vpop.f32.mrb[0].mxu0 }
 0x22f   :  { %v153_v37 = vadd.f32 %v184_v35, %v152_v36  ;;  %v197_v38 = vpop.f32.mrb[1].mxu0 }
 0x230   :  { %v155_v39 = vpop.f32.mrb[2].mxu0 }
 0x231   :  { %v161_v40 = vadd.f32 %v153_v37, %v40_v0  ;;  %v156_v41 = vadd.f32 %v184_v35, %v155_v39  ;;  %v198_v42 = vpop.f32.mrb[3].mxu0 }
 0x233   :  { %163 = vst.msk [vmem:[#allocation6] sm:$0xff] %vm42_vm0, %v161_v40  ;;  %v162_v43 = vadd.f32 %v156_v41, %v41_v1 }
 0x235   :  { %164 = vst.msk [vmem:[#allocation6 + $0x8] sm:$0xff] %vm42_vm0, %v162_v43 }
 0x236   :  { %244 = shalt.err (!%p241_p12)
}
 0x237   :  { %s245_s17 = scalar_lea.hbm %s353_s5, 256 }
 0x238   :  { %p246_p13 = scmp.ne.s32.totalorder %s353_s5, %s245_s17  ;;  %p249_p0 = scmp.lt.u32.totalorder %s245_s17, %s353_s5 }
 0x23a   :  { %p251_p1 = pnand %p249_p0, %p246_p13 }
 0x23c   :  { %254 = shalt.err (!%p251_p1)
}
 0x23d   :  { %176 = dma.vmem_to_hbm [thread:$0]  %s171_s15, 256, %s353_s5, [#allocation5], %s260_s28, %s260_s28, %s261_s29  }
 0x23e   :  { %257 = dma.done.wait [#allocation5], 256  }
 0x23f   :  { %258 = vsyncadd [#allocation5], 4294967040 }
 0x240   :  { %180 = vsyncpa [#allocation4], 1 }
 0x241   :  { %181 = vsyncpa [#allocation5], 1 }

</bundles_post_ra>
